<compile_context>
chip_gen: v7x
topology: tpu7x:2x2x1
jax: 0.10.0
libtpu: 0.0.40
codegen_flags: <defaults>
</compile_context>

<pallas_src>
import jax
import jax.numpy as jnp
from jax import lax
from jax.experimental import pallas as pl
from jax.experimental.pallas import tpu as pltpu


# ----------------------------------------------------------------------------
# Helpers
# ----------------------------------------------------------------------------
def _pick_tile(n, pref, align):
    """Largest tile <= pref that divides n and is a multiple of `align`.
    Falls back to the full extent n (a block equal to the array dim is always
    a legal block shape)."""
    t = min(pref, n)
    if t == n:
        return n
    t = (t // align) * align
    while t >= align:
        if n % t == 0:
            return t
        t -= align
    return n


def _vmem_limit(estimate_bytes):
    """Explicit scoped-VMEM limit: above every generation's default (16/32 MiB)
    but below v7x's 64 MiB physical VMEM."""
    return int(min(max(estimate_bytes, 32 * 1024 * 1024), 48 * 1024 * 1024))


# ----------------------------------------------------------------------------
# Stage 1: both branch MLPs over one row tile of x, two outputs (z_s, z_t).
# ----------------------------------------------------------------------------
def _mlp_kernel(x_ref, w1s_ref, b1s_ref, w2s_ref, b2s_ref,
                w1t_ref, b1t_ref, w2t_ref, b2t_ref, zs_ref, zt_ref):
    # x:(TM,E) bf16, w1*: (E,F) bf16, b1*: (1,F) f32, w2*: (F,H) bf16, b2*: (1,H) f32
    x = x_ref[...]

    hs = jnp.dot(x, w1s_ref[...], preferred_element_type=jnp.float32)
    hs = jnp.maximum(hs + b1s_ref[...], 0.0)            # bias + ReLU in f32
    # Dropout(p=0.0) == identity in inference mode.
    zs = jnp.dot(hs.astype(jnp.bfloat16), w2s_ref[...],
                 preferred_element_type=jnp.float32) + b2s_ref[...]
    zs_ref[...] = zs.astype(zs_ref.dtype)

    ht = jnp.dot(x, w1t_ref[...], preferred_element_type=jnp.float32)
    ht = jnp.maximum(ht + b1t_ref[...], 0.0)
    zt = jnp.dot(ht.astype(jnp.bfloat16), w2t_ref[...],
                 preferred_element_type=jnp.float32) + b2t_ref[...]
    zt_ref[...] = zt.astype(zt_ref.dtype)


# ----------------------------------------------------------------------------
# Stage 2: pairwise scores  S[i, j] = <z_s[i], z_t[j]>,  2-D tiled grid.
# ----------------------------------------------------------------------------
def _make_score_kernel(tn, zt_resident):
    if zt_resident:
        # z_t is the full (N, H) array, VMEM-resident (constant index_map);
        # slice the (tn, H) column block for this grid step in-kernel.
        def kernel(zs_ref, zt_ref, out_ref):
            j0 = pl.multiple_of(pl.program_id(1) * tn, tn)
            zt = zt_ref[pl.ds(j0, tn), :]
            acc = lax.dot_general(
                zs_ref[...], zt,
                dimension_numbers=(((1,), (1,)), ((), ())),   # contract last dims
                preferred_element_type=jnp.float32)
            out_ref[...] = acc.astype(out_ref.dtype)
    else:
        def kernel(zs_ref, zt_ref, out_ref):
            acc = lax.dot_general(
                zs_ref[...], zt_ref[...],
                dimension_numbers=(((1,), (1,)), ((), ())),
                preferred_element_type=jnp.float32)
            out_ref[...] = acc.astype(out_ref.dtype)
    return kernel


# ----------------------------------------------------------------------------
# Wrapper
# ----------------------------------------------------------------------------
def link_predictor(x, params, *, row_tile=512, tm=512, tn=1024,
                   out_dtype=jnp.float32, zt_resident=None):
    """x: (N, E) float32.  params: dict from init_params().  Returns (N, N) logits."""
    N, E = x.shape
    F = params["w1s"].shape[1]
    H = params["w2s"].shape[1]

    # bf16 operands for the MXU; biases stay f32 (elementwise path).
    x_bf = x.astype(jnp.bfloat16)
    w1s = params["w1s"].astype(jnp.bfloat16)
    w2s = params["w2s"].astype(jnp.bfloat16)
    w1t = params["w1t"].astype(jnp.bfloat16)
    w2t = params["w2t"].astype(jnp.bfloat16)
    b1s = params["b1s"].astype(jnp.float32)
    b2s = params["b2s"].astype(jnp.float32)
    b1t = params["b1t"].astype(jnp.float32)
    b2t = params["b2t"].astype(jnp.float32)

    # Tile sizes: big by default (amortize ~0.35 us/grid-step, lane-dense output
    # writes), adjusted to divide N (fallback: full extent).
    row_tile = _pick_tile(N, row_tile, 8)
    tm = _pick_tile(N, tm, 8)
    tn = _pick_tile(N, tn, 128)

    # ---- stage 1: z_s, z_t; pipelined over row tiles; weights VMEM-resident ----
    w_bytes = 2 * (E * F + F * H) * 2 + 2 * (F + H) * 4
    est1 = 2 * (row_tile * E * 2) + 4 * (row_tile * H * 2) + w_bytes + (4 << 20)
    z_s, z_t = pl.pallas_call(
        _mlp_kernel,
        grid=(N // row_tile,),
        in_specs=[
            pl.BlockSpec((row_tile, E), lambda i: (i, 0)),   # x rows (pipelined)
            pl.BlockSpec((E, F), lambda i: (0, 0)),          # constant blocks ->
            pl.BlockSpec((1, F), lambda i: (0, 0)),          #   VMEM-resident weights
            pl.BlockSpec((F, H), lambda i: (0, 0)),
            pl.BlockSpec((1, H), lambda i: (0, 0)),
            pl.BlockSpec((E, F), lambda i: (0, 0)),
            pl.BlockSpec((1, F), lambda i: (0, 0)),
            pl.BlockSpec((F, H), lambda i: (0, 0)),
            pl.BlockSpec((1, H), lambda i: (0, 0)),
        ],
        out_specs=(
            pl.BlockSpec((row_tile, H), lambda i: (i, 0)),
            pl.BlockSpec((row_tile, H), lambda i: (i, 0)),
        ),
        out_shape=(
            jax.ShapeDtypeStruct((N, H), jnp.bfloat16),
            jax.ShapeDtypeStruct((N, H), jnp.bfloat16),
        ),
        compiler_params=pltpu.CompilerParams(
            dimension_semantics=("parallel",),
            vmem_limit_bytes=_vmem_limit(est1)),
    )(x_bf, w1s, b1s, w2s, b2s, w1t, b1t, w2t, b2t)

    # ---- stage 2: (N, N) logits.  HBM-write-bound: big lane-dense output tiles,
    # both grid axes parallel (outer i axis is the one sharded on v7x megacore),
    # z_t kept fully VMEM-resident when small so the DMA engine is free for the
    # output writeback.
    if zt_resident is None:
        zt_resident = (N * H * 2) <= (4 << 20)
    zt_buf_bytes = (N * H * 2) if zt_resident else (2 * tn * H * 2)
    out_itemsize = jnp.dtype(out_dtype).itemsize
    est2 = 2 * (tm * H * 2) + zt_buf_bytes + 2 * (tm * tn * out_itemsize) + (4 << 20)

    if zt_resident:
        zt_spec = pl.BlockSpec((N, H), lambda i, j: (0, 0))     # loaded once, resident
    else:
        zt_spec = pl.BlockSpec((tn, H), lambda i, j: (j, 0))

    logits = pl.pallas_call(
        _make_score_kernel(tn, zt_resident),
        grid=(N // tm, N // tn),
        in_specs=[
            pl.BlockSpec((tm, H), lambda i, j: (i, 0)),
            zt_spec,
        ],
        out_specs=pl.BlockSpec((tm, tn), lambda i, j: (i, j)),
        out_shape=jax.ShapeDtypeStruct((N, N), out_dtype),
        compiler_params=pltpu.CompilerParams(
            dimension_semantics=("parallel", "parallel"),
            vmem_limit_bytes=_vmem_limit(est2)),
    )(z_s, z_t)
    return logits


# ----------------------------------------------------------------------------
# Parameter construction (mirrors the PyTorch module layout, weights stored
# transposed vs. PyTorch, i.e. (in, out)).
# ----------------------------------------------------------------------------
def init_params(key, emb_size, ff_size, hidden_size):
    ks = jax.random.split(key, 8)

    def lin(kw, kb, fan_in, fan_out):
        bound = 1.0 / jnp.sqrt(fan_in)
        w = jax.random.uniform(kw, (fan_in, fan_out), jnp.float32, -bound, bound)
        b = jax.random.uniform(kb, (1, fan_out), jnp.float32, -bound, bound)
        return w, b

    w1s, b1s = lin(ks[0], ks[1], emb_size, ff_size)
    w2s, b2s = lin(ks[2], ks[3], ff_size, hidden_size)
    w1t, b1t = lin(ks[4], ks[5], emb_size, ff_size)
    w2t, b2t = lin(ks[6], ks[7], ff_size, hidden_size)
    return dict(w1s=w1s, b1s=b1s, w2s=w2s, b2s=b2s,
                w1t=w1t, b1t=b1t, w2t=w2t, b2t=b2t)


def link_predictor_ref(x, p):
    """Module forward in plain JAX with the SAME mixed-precision policy as the
    kernel (bf16 MXU operands, f32 accumulation / elementwise)."""
    def mlp(x, w1, b1, w2, b2):
        h = jnp.dot(x.astype(jnp.bfloat16), w1.astype(jnp.bfloat16),
                    preferred_element_type=jnp.float32) + b1
        h = jnp.maximum(h, 0.0)
        z = jnp.dot(h.astype(jnp.bfloat16), w2.astype(jnp.bfloat16),
                    preferred_element_type=jnp.float32) + b2
        return z.astype(jnp.bfloat16)

    z_s = mlp(x, p["w1s"], p["b1s"], p["w2s"], p["b2s"])
    z_t = mlp(x, p["w1t"], p["b1t"], p["w2t"], p["b2t"])
    return lax.dot_general(z_s, z_t, (((1,), (1,)), ((), ())),
                           preferred_element_type=jnp.float32)


if __name__ == "__main__":
    emb_size, ff_size, hidden_size = 32, 64, 32
    N = 256  # number of elements (nodes); (N, N) logits output

    key = jax.random.PRNGKey(0)
    kx, kp = jax.random.split(key)
    x = jax.random.normal(kx, (N, emb_size), jnp.float32)
    params = init_params(kp, emb_size, ff_size, hidden_size)

    ref = jax.block_until_ready(link_predictor_ref(x, params))

    # Default path: big tiles clamped to N, z_t VMEM-resident in stage 2.
    out = jax.block_until_ready(link_predictor(x, params))
    assert out.shape == (N, N)
    assert jnp.allclose(out, ref, atol=5e-3, rtol=5e-3), (
        "mismatch vs reference (resident path), max abs err = "
        f"{float(jnp.max(jnp.abs(out - ref)))}")

    # Also exercise the tiled z_t path (used when z_t is too big to be resident).
    out2 = jax.block_until_ready(
        link_predictor(x, params, row_tile=128, tm=128, tn=128, zt_resident=False))
    assert jnp.allclose(out2, ref, atol=5e-3, rtol=5e-3), (
        "mismatch vs reference (tiled path), max abs err = "
        f"{float(jnp.max(jnp.abs(out2 - ref)))}")

    print("KERNEL_OK")
</pallas_src>

<mosaic_0001>
module attributes {stable_mosaic.version = 11 : i64} {
  func.func @_mlp_kernel(%arg0: i32, %arg1: memref<256x32xbf16, #tpu.memory_space<vmem>>, %arg2: memref<32x64xbf16, #tpu.memory_space<vmem>>, %arg3: memref<1x64xf32, #tpu.memory_space<vmem>>, %arg4: memref<64x32xbf16, #tpu.memory_space<vmem>>, %arg5: memref<1x32xf32, #tpu.memory_space<vmem>>, %arg6: memref<32x64xbf16, #tpu.memory_space<vmem>>, %arg7: memref<1x64xf32, #tpu.memory_space<vmem>>, %arg8: memref<64x32xbf16, #tpu.memory_space<vmem>>, %arg9: memref<1x32xf32, #tpu.memory_space<vmem>>, %arg10: memref<256x32xbf16, #tpu.memory_space<vmem>>, %arg11: memref<256x32xbf16, #tpu.memory_space<vmem>>) attributes {dimension_semantics = [#tpu.dimension_semantics<parallel>], iteration_bounds = array<i64: 1>, scalar_prefetch = 0 : i64, scratch_operands = 0 : i64, tpu.core_type = #tpu.core_type<tc>, window_params = [{transform_indices = @transform_0, window_bounds = array<i64: 256, 32>}, {pipeline_mode = #tpu.pipeline_mode<synchronous>, transform_indices = @transform_1, window_bounds = array<i64: 32, 64>}, {pipeline_mode = #tpu.pipeline_mode<synchronous>, transform_indices = @transform_2, window_bounds = array<i64: 1, 64>}, {pipeline_mode = #tpu.pipeline_mode<synchronous>, transform_indices = @transform_3, window_bounds = array<i64: 64, 32>}, {pipeline_mode = #tpu.pipeline_mode<synchronous>, transform_indices = @transform_4, window_bounds = array<i64: 1, 32>}, {pipeline_mode = #tpu.pipeline_mode<synchronous>, transform_indices = @transform_5, window_bounds = array<i64: 32, 64>}, {pipeline_mode = #tpu.pipeline_mode<synchronous>, transform_indices = @transform_6, window_bounds = array<i64: 1, 64>}, {pipeline_mode = #tpu.pipeline_mode<synchronous>, transform_indices = @transform_7, window_bounds = array<i64: 64, 32>}, {pipeline_mode = #tpu.pipeline_mode<synchronous>, transform_indices = @transform_8, window_bounds = array<i64: 1, 32>}, {transform_indices = @transform_9, window_bounds = array<i64: 256, 32>}, {transform_indices = @transform_10, window_bounds = array<i64: 256, 32>}]} {
    %c0 = arith.constant 0 : index
    %c0_0 = arith.constant 0 : index
    %0 = vector.load %arg1[%c0, %c0_0] : memref<256x32xbf16, #tpu.memory_space<vmem>>, vector<256x32xbf16>
    %c0_1 = arith.constant 0 : index
    %c0_2 = arith.constant 0 : index
    %1 = vector.load %arg2[%c0_1, %c0_2] : memref<32x64xbf16, #tpu.memory_space<vmem>>, vector<32x64xbf16>
    %cst = arith.constant dense<0.000000e+00> : vector<256x64xf32>
    %2 = tpu.matmul %0, %1, %cst {dimension_numbers = #tpu.dot_dimension_numbers<[1], [0], [0], [1], [0, 0, 1, 1], [], []>} : vector<256x32xbf16>, vector<32x64xbf16>, vector<256x64xf32> -> vector<256x64xf32>
    %c0_3 = arith.constant 0 : index
    %c0_4 = arith.constant 0 : index
    %3 = vector.load %arg3[%c0_3, %c0_4] : memref<1x64xf32, #tpu.memory_space<vmem>>, vector<1x64xf32>
    %4 = vector.broadcast %3 : vector<1x64xf32> to vector<256x64xf32>
    %5 = arith.addf %2, %4 : vector<256x64xf32>
    %cst_5 = arith.constant 0.000000e+00 : f32
    %6 = vector.broadcast %cst_5 : f32 to vector<256x64xf32>
    %7 = arith.maximumf %5, %6 : vector<256x64xf32>
    %8 = arith.truncf %7 : vector<256x64xf32> to vector<256x64xbf16>
    %c0_6 = arith.constant 0 : index
    %c0_7 = arith.constant 0 : index
    %9 = vector.load %arg4[%c0_6, %c0_7] : memref<64x32xbf16, #tpu.memory_space<vmem>>, vector<64x32xbf16>
    %cst_8 = arith.constant dense<0.000000e+00> : vector<256x32xf32>
    %10 = tpu.matmul %8, %9, %cst_8 {dimension_numbers = #tpu.dot_dimension_numbers<[1], [0], [0], [1], [0, 0, 1, 1], [], []>} : vector<256x64xbf16>, vector<64x32xbf16>, vector<256x32xf32> -> vector<256x32xf32>
    %c0_9 = arith.constant 0 : index
    %c0_10 = arith.constant 0 : index
    %11 = vector.load %arg5[%c0_9, %c0_10] : memref<1x32xf32, #tpu.memory_space<vmem>>, vector<1x32xf32>
    %12 = vector.broadcast %11 : vector<1x32xf32> to vector<256x32xf32>
    %13 = arith.addf %10, %12 : vector<256x32xf32>
    %14 = arith.truncf %13 : vector<256x32xf32> to vector<256x32xbf16>
    %c0_11 = arith.constant 0 : index
    %c0_12 = arith.constant 0 : index
    %15 = vector.load %arg10[%c0_11, %c0_12] : memref<256x32xbf16, #tpu.memory_space<vmem>>, vector<256x32xbf16>
    tpu.vector_store %arg10[%c0_11, %c0_12], %14 {strides = array<i32>} : memref<256x32xbf16, #tpu.memory_space<vmem>>, vector<256x32xbf16>,
    %c0_13 = arith.constant 0 : index
    %c0_14 = arith.constant 0 : index
    %16 = vector.load %arg6[%c0_13, %c0_14] : memref<32x64xbf16, #tpu.memory_space<vmem>>, vector<32x64xbf16>
    %cst_15 = arith.constant dense<0.000000e+00> : vector<256x64xf32>
    %17 = tpu.matmul %0, %16, %cst_15 {dimension_numbers = #tpu.dot_dimension_numbers<[1], [0], [0], [1], [0, 0, 1, 1], [], []>} : vector<256x32xbf16>, vector<32x64xbf16>, vector<256x64xf32> -> vector<256x64xf32>
    %c0_16 = arith.constant 0 : index
    %c0_17 = arith.constant 0 : index
    %18 = vector.load %arg7[%c0_16, %c0_17] : memref<1x64xf32, #tpu.memory_space<vmem>>, vector<1x64xf32>
    %19 = vector.broadcast %18 : vector<1x64xf32> to vector<256x64xf32>
    %20 = arith.addf %17, %19 : vector<256x64xf32>
    %cst_18 = arith.constant 0.000000e+00 : f32
    %21 = vector.broadcast %cst_18 : f32 to vector<256x64xf32>
    %22 = arith.maximumf %20, %21 : vector<256x64xf32>
    %23 = arith.truncf %22 : vector<256x64xf32> to vector<256x64xbf16>
    %c0_19 = arith.constant 0 : index
    %c0_20 = arith.constant 0 : index
    %24 = vector.load %arg8[%c0_19, %c0_20] : memref<64x32xbf16, #tpu.memory_space<vmem>>, vector<64x32xbf16>
    %cst_21 = arith.constant dense<0.000000e+00> : vector<256x32xf32>
    %25 = tpu.matmul %23, %24, %cst_21 {dimension_numbers = #tpu.dot_dimension_numbers<[1], [0], [0], [1], [0, 0, 1, 1], [], []>} : vector<256x64xbf16>, vector<64x32xbf16>, vector<256x32xf32> -> vector<256x32xf32>
    %c0_22 = arith.constant 0 : index
    %c0_23 = arith.constant 0 : index
    %26 = vector.load %arg9[%c0_22, %c0_23] : memref<1x32xf32, #tpu.memory_space<vmem>>, vector<1x32xf32>
    %27 = vector.broadcast %26 : vector<1x32xf32> to vector<256x32xf32>
    %28 = arith.addf %25, %27 : vector<256x32xf32>
    %29 = arith.truncf %28 : vector<256x32xf32> to vector<256x32xbf16>
    %c0_24 = arith.constant 0 : index
    %c0_25 = arith.constant 0 : index
    %30 = vector.load %arg11[%c0_24, %c0_25] : memref<256x32xbf16, #tpu.memory_space<vmem>>, vector<256x32xbf16>
    tpu.vector_store %arg11[%c0_24, %c0_25], %29 {strides = array<i32>} : memref<256x32xbf16, #tpu.memory_space<vmem>>, vector<256x32xbf16>,
    return
  }
  func.func @transform_0(%arg0: i32) -> (i32, i32) {
    %c0_i32 = arith.constant 0 : i32
    %c0_i32_0 = arith.constant 0 : i32
    return %arg0, %c0_i32 : i32, i32
  }
  func.func @transform_1(%arg0: i32) -> (i32, i32) {
    %c0_i32 = arith.constant 0 : i32
    %c0_i32_0 = arith.constant 0 : i32
    %c0_i32_1 = arith.constant 0 : i32
    return %c0_i32, %c0_i32_0 : i32, i32
  }
  func.func @transform_2(%arg0: i32) -> (i32, i32) {
    %c0_i32 = arith.constant 0 : i32
    %c0_i32_0 = arith.constant 0 : i32
    %c0_i32_1 = arith.constant 0 : i32
    return %c0_i32, %c0_i32_0 : i32, i32
  }
  func.func @transform_3(%arg0: i32) -> (i32, i32) {
    %c0_i32 = arith.constant 0 : i32
    %c0_i32_0 = arith.constant 0 : i32
    %c0_i32_1 = arith.constant 0 : i32
    return %c0_i32, %c0_i32_0 : i32, i32
  }
  func.func @transform_4(%arg0: i32) -> (i32, i32) {
    %c0_i32 = arith.constant 0 : i32
    %c0_i32_0 = arith.constant 0 : i32
    %c0_i32_1 = arith.constant 0 : i32
    return %c0_i32, %c0_i32_0 : i32, i32
  }
  func.func @transform_5(%arg0: i32) -> (i32, i32) {
    %c0_i32 = arith.constant 0 : i32
    %c0_i32_0 = arith.constant 0 : i32
    %c0_i32_1 = arith.constant 0 : i32
    return %c0_i32, %c0_i32_0 : i32, i32
  }
  func.func @transform_6(%arg0: i32) -> (i32, i32) {
    %c0_i32 = arith.constant 0 : i32
    %c0_i32_0 = arith.constant 0 : i32
    %c0_i32_1 = arith.constant 0 : i32
    return %c0_i32, %c0_i32_0 : i32, i32
  }
  func.func @transform_7(%arg0: i32) -> (i32, i32) {
    %c0_i32 = arith.constant 0 : i32
    %c0_i32_0 = arith.constant 0 : i32
    %c0_i32_1 = arith.constant 0 : i32
    return %c0_i32, %c0_i32_0 : i32, i32
  }
  func.func @transform_8(%arg0: i32) -> (i32, i32) {
    %c0_i32 = arith.constant 0 : i32
    %c0_i32_0 = arith.constant 0 : i32
    %c0_i32_1 = arith.constant 0 : i32
    return %c0_i32, %c0_i32_0 : i32, i32
  }
  func.func @transform_9(%arg0: i32) -> (i32, i32) {
    %c0_i32 = arith.constant 0 : i32
    %c0_i32_0 = arith.constant 0 : i32
    return %arg0, %c0_i32 : i32, i32
  }
  func.func @transform_10(%arg0: i32) -> (i32, i32) {
    %c0_i32 = arith.constant 0 : i32
    %c0_i32_0 = arith.constant 0 : i32
    return %arg0, %c0_i32 : i32, i32
  }
}

</mosaic_0001>

<bundles_post_ra>
// kernel: tpu_custom_call.1
= control target key start
LH: loop header
LB: loop body
LE: loop exit
PB: predicated region body
PF: predicated region fallthrough
CT: control target
= control target key end

     0   :  { %vm170_vm0 = vcmask 261120   ;;  %vm467_vm1 = vcmask 523264   ;;  %vm805_vm2 = vcmask 257024   ;;  %s2573_s1 = inlined_call_operand.vmem [shape: bf16[32,64], index: 1, kind: input, shape index: {}]   ;;  %s2574_s0 = inlined_call_operand.vmem [shape: bf16[256,32], index: 0, kind: input, shape index: {}]   ;;  %s2575_s5 = inlined_call_operand.vmem [shape: bf16[32,64], index: 5, kind: input, shape index: {}]   ;;  %s2576_s3 = inlined_call_operand.vmem [shape: bf16[64,32], index: 3, kind: input, shape index: {}]   ;;  %s2577_s7 = inlined_call_operand.vmem [shape: bf16[64,32], index: 7, kind: input, shape index: {}]   ;;  %s2578_s2 = inlined_call_operand.vmem [shape: f32[1,64], index: 2, kind: input, shape index: {}]   ;;  %s2579_s6 = inlined_call_operand.vmem [shape: f32[1,64], index: 6, kind: input, shape index: {}]   ;;  %s2580_s4 = inlined_call_operand.vmem [shape: f32[1,32], index: 4, kind: input, shape index: {}]   ;;  %s2581_s9 = inlined_call_operand.vmem [shape: bf16[256,32], index: 9, kind: output, shape index: {0}]   ;;  %s2582_s8 = inlined_call_operand.vmem [shape: f32[1,32], index: 8, kind: input, shape index: {}]   ;;  %s2583_s10 = inlined_call_operand.vmem [shape: bf16[256,32], index: 10, kind: output, shape index: {1}]  }
   0x1   :  { %v1938_v0 = vld [vmem:[%s2573_s1] sm:$0xff]   ;;  %v1939_v1 = vld [vmem:[%s2573_s1 + $0x8] sm:$0xff]   ;;  %v1943_v5 = vld [vmem:[%s2574_s0 + $0x10] sm:$0xff]  }
   0x2   :  { %1786 = vmatprep.subr.bf16.mxu0 %v1938_v0  ;;  %v1940_v2 = vld [vmem:[%s2574_s0] sm:$0xff]   ;;  %v1941_v4 = vld [vmem:[%s2574_s0 + $0x8] sm:$0xff]   ;;  %v1944_v7 = vld [vmem:[%s2574_s0 + $0x18] sm:$0xff]  }
   0x3   :  { %1787 = vmatpush3.bf16.msra.mxu0 %v1938_v0  ;;  %1790 = vmatprep.mubr.msk.bf16.mxu0 %vm170_vm0, %v1940_v2  ;;  %v1942_v3 = vld [vmem:[%s2575_s5] sm:$0xff]   ;;  %v1951_v6 = vld [vmem:[%s2575_s5 + $0x8] sm:$0xff]   ;;  %v1947_v12 = vld [vmem:[%s2574_s0 + $0x30] sm:$0xff]  }
   0x4   :  { %1788 = vmatprep.subr.bf16.mxu0 %v1939_v1  ;;  %v1945_v8 = vld [vmem:[%s2574_s0 + $0x20] sm:$0xff]   ;;  %v1946_v9 = vld [vmem:[%s2574_s0 + $0x28] sm:$0xff]   ;;  %v1948_v13 = vld [vmem:[%s2574_s0 + $0x38] sm:$0xff]  }
   0x5   :  { %v1958_v10 = vld [vmem:[%s2576_s3] sm:$0xff]   ;;  %v1959_v11 = vld [vmem:[%s2576_s3 + $0x8] sm:$0xff]   ;;  %v1952_v16 = vld [vmem:[%s2574_s0 + $0x50] sm:$0xff]  }
   0x6   :  { %1822 = vmatprep.subr.bf16.mxu1 %v1958_v10  ;;  %v1949_v14 = vld [vmem:[%s2574_s0 + $0x40] sm:$0xff]   ;;  %v1950_v15 = vld [vmem:[%s2574_s0 + $0x48] sm:$0xff]   ;;  %v1953_v17 = vld [vmem:[%s2574_s0 + $0x58] sm:$0xff]  }
   0x7   :  { %1789 = vmatpush3.bf16.msra.mxu0 %v1939_v1  ;;  %1823 = vmatpush3.bf16.msra.mxu1 %v1958_v10  ;;  %v1954_v18 = vld [vmem:[%s2574_s0 + $0x60] sm:$0xff]   ;;  %v1955_v19 = vld [vmem:[%s2574_s0 + $0x68] sm:$0xff]   ;;  %v1956_v20 = vld [vmem:[%s2574_s0 + $0x70] sm:$0xff]  }
   0x8   :  { %1862 = vmatprep.subr.bf16.mxu0 %v1942_v3  ;;  %1824 = vmatprep.subr.bf16.mxu1 %v1959_v11  ;;  %v1957_v21 = vld [vmem:[%s2574_s0 + $0x78] sm:$0xff]   ;;  %v1960_v22 = vld [vmem:[%s2576_s3 + $0x10] sm:$0xff]   ;;  %v1962_v24 = vld [vmem:[%s2577_s7] sm:$0xff]  }
   0x9   :  { %v1961_v23 = vld [vmem:[%s2576_s3 + $0x18] sm:$0xff]   ;;  %v2131_v25 = vld [vmem:[%s2578_s2] ss:$0 sm:$0xff]  ;;  %v1963_v43 = vld [vmem:[%s2577_s7 + $0x8] sm:$0xff]  }
   0xa   :  { %1791 = vmatmul.mubr.msk.bf16.vlgmr.msra.gmra.mrb[0].mxu0 %vm170_vm0, %v1941_v4  ;;  %v1964_v51 = vld [vmem:[%s2577_s7 + $0x10] sm:$0xff]   ;;  %v1965_v59 = vld [vmem:[%s2577_s7 + $0x18] sm:$0xff]  }
   0xb   :  { %1863 = vmatpush3.bf16.msra.mxu0 %v1942_v3  ;;  %1794 = vmatprep.mubr.msk.bf16.mxu0 %vm170_vm0, %v1943_v5 }
   0xc   :  { %1864 = vmatprep.subr.bf16.mxu0 %v1951_v6  ;;  %1825 = vmatpush3.bf16.msra.mxu1 %v1959_v11 }
   0xd   :  { %1826 = vmatprep.subr.bf16.mxu1 %v1960_v22 }
   0xf   :  { %1865 = vmatpush3.bf16.msra.mxu0 %v1951_v6 }
  0x10   :  { %1827 = vmatpush3.bf16.msra.mxu1 %v1960_v22 }
  0x11   :  { %1828 = vmatprep.subr.bf16.mxu1 %v1961_v23 }
  0x12   :  { %1795 = vmatmul.mubr.msk.bf16.gmra.mrb[4].mxu0 %vm170_vm0, %v1944_v7 }
  0x13   :  { %1798 = vmatprep.mubr.msk.bf16.mxu0 %vm170_vm0, %v1945_v8 }
  0x14   :  { %1829 = vmatpush3.bf16.msra.mxu1 %v1961_v23 }
  0x15   :  { %1898 = vmatprep.subr.bf16.mxu1 %v1962_v24 }
  0x1a   :  { %1799 = vmatmul.mubr.msk.bf16.gmra.mrb[8].mxu0 %vm170_vm0, %v1946_v9 }
  0x1b   :  { %1802 = vmatprep.mubr.msk.bf16.mxu0 %vm170_vm0, %v1947_v12 }
  0x22   :  { %1803 = vmatmul.mubr.msk.bf16.gmra.mrb[12].mxu0 %vm170_vm0, %v1948_v13 }
  0x23   :  { %1806 = vmatprep.mubr.msk.bf16.mxu0 %vm170_vm0, %v1949_v14 }
  0x2a   :  { %1807 = vmatmul.mubr.msk.bf16.gmra.mrb[16].mxu0 %vm170_vm0, %v1950_v15 }
  0x2b   :  { %1810 = vmatprep.mubr.msk.bf16.mxu0 %vm170_vm0, %v1952_v16 }
  0x32   :  { %1811 = vmatmul.mubr.msk.bf16.gmra.mrb[20].mxu0 %vm170_vm0, %v1953_v17 }
  0x33   :  { %1814 = vmatprep.mubr.msk.bf16.mxu0 %vm170_vm0, %v1954_v18 }
  0x3a   :  { %1815 = vmatmul.mubr.msk.bf16.gmra.mrb[24].mxu0 %vm170_vm0, %v1955_v19 }
  0x3b   :  { %1818 = vmatprep.mubr.msk.bf16.mxu0 %vm170_vm0, %v1956_v20 }
  0x42   :  { %1819 = vmatmul.mubr.msk.bf16.gmra.mrb[28].mxu0 %vm170_vm0, %v1957_v21 }
  0x43   :  { %1866 = vmatprep.mubr.msk.bf16.mxu0 %vm170_vm0, %v1940_v2 }
  0x4a   :  { %1867 = vmatmul.mubr.msk.bf16.vlgmr.msra.gmra.mrb[32].mxu0 %vm170_vm0, %v1941_v4 }
  0x4b   :  { %1870 = vmatprep.mubr.msk.bf16.mxu0 %vm170_vm0, %v1943_v5 }
  0x52   :  { %1871 = vmatmul.mubr.msk.bf16.gmra.mrb[36].mxu0 %vm170_vm0, %v1944_v7 }
  0x53   :  { %1874 = vmatprep.mubr.msk.bf16.mxu0 %vm170_vm0, %v1945_v8 }
  0x5a   :  { %1875 = vmatmul.mubr.msk.bf16.gmra.mrb[40].mxu0 %vm170_vm0, %v1946_v9 }
  0x5b   :  { %1878 = vmatprep.mubr.msk.bf16.mxu0 %vm170_vm0, %v1947_v12 }
  0x62   :  { %1879 = vmatmul.mubr.msk.bf16.gmra.mrb[44].mxu0 %vm170_vm0, %v1948_v13 }
  0x63   :  { %1882 = vmatprep.mubr.msk.bf16.mxu0 %vm170_vm0, %v1949_v14 }
  0x6a   :  { %1883 = vmatmul.mubr.msk.bf16.gmra.mrb[48].mxu0 %vm170_vm0, %v1950_v15 }
  0x6b   :  { %1886 = vmatprep.mubr.msk.bf16.mxu0 %vm170_vm0, %v1952_v16 }
  0x72   :  { %1887 = vmatmul.mubr.msk.bf16.gmra.mrb[52].mxu0 %vm170_vm0, %v1953_v17 }
  0x73   :  { %1890 = vmatprep.mubr.msk.bf16.mxu0 %vm170_vm0, %v1954_v18 }
  0x7a   :  { %1891 = vmatmul.mubr.msk.bf16.gmra.mrb[56].mxu0 %vm170_vm0, %v1955_v19 }
  0x7b   :  { %1894 = vmatprep.mubr.msk.bf16.mxu0 %vm170_vm0, %v1956_v20 }
  0x82   :  { %1895 = vmatmul.mubr.msk.bf16.gmra.mrb[60].mxu0 %vm170_vm0, %v1957_v21 }
  0xdd   :  { %v1792_v26 = vpop.f32.mrb[0].mxu0 }
  0xde   :  { %v262_v27 = vadd.f32 %v1792_v26, %v2131_v25  ;;  %v253_v28 = vpop.f32.mrb[1].mxu0 }
  0xdf   :  { %v254_v29 = vadd.f32 %v2131_v25, %v253_v28  ;;  %v1793_v30 = vpop.f32.mrb[2].mxu0 }
  0xe0   :  { %v265_v31 = vadd.f32 %v1793_v30, %v2131_v25  ;;  %v256_v32 = vpop.f32.mrb[3].mxu0  ;;  %v382_v34 = vmax.f32 %v262_v27, 0.0 }
  0xe1   :  { %v257_v33 = vadd.f32 %v2131_v25, %v256_v32  ;;  %v380_v36 = vmax.f32 %v254_v29, 0.0 }
  0xe2   :  { %v383_v35 = vmax.f32 %v265_v31, 0.0 }
  0xe3   :  { %v381_v37 = vmax.f32 %v257_v33, 0.0 }
  0xe4   :  { %v413_v38 = vpack.c.bf16 %v383_v35, %v382_v34 }
  0xe5   :  { %v1796_v39 = vpop.f32.mrb[4].mxu0  ;;  %v412_v40 = vpack.c.bf16 %v381_v37, %v380_v36 }
  0xe6   :  { %v278_v41 = vadd.f32 %v1796_v39, %v2131_v25  ;;  %v269_v42 = vpop.f32.mrb[5].mxu0 }
  0xe7   :  { %v270_v44 = vadd.f32 %v2131_v25, %v269_v42  ;;  %v1797_v45 = vpop.f32.mrb[6].mxu0  ;;  %1830 = vmatprep.mubr.msk.bf16.mxu1 %vm467_vm1, %v412_v40 }
  0xe8   :  { %v281_v46 = vadd.f32 %v1797_v45, %v2131_v25  ;;  %v272_v47 = vpop.f32.mrb[7].mxu0  ;;  %1831 = vmatmul.mubr.msk.bf16.vlgmr.msra.gmra.mrb[0].mxu1 %vm467_vm1, %v413_v38  ;;  %v386_v49 = vmax.f32 %v278_v41, 0.0 }
  0xe9   :  { %v273_v48 = vadd.f32 %v2131_v25, %v272_v47  ;;  %1899 = vmatpush3.bf16.msra.mxu1 %v1962_v24  ;;  %v384_v52 = vmax.f32 %v270_v44, 0.0 }
  0xea   :  { %v387_v50 = vmax.f32 %v281_v46, 0.0  ;;  %1900 = vmatprep.subr.bf16.mxu1 %v1963_v43 }
  0xeb   :  { %v385_v53 = vmax.f32 %v273_v48, 0.0 }
  0xec   :  { %v415_v54 = vpack.c.bf16 %v387_v50, %v386_v49 }
  0xed   :  { %v414_v55 = vpack.c.bf16 %v385_v53, %v384_v52  ;;  %v1800_v56 = vpop.f32.mrb[8].mxu0  ;;  %1901 = vmatpush3.bf16.msra.mxu1 %v1963_v43 }
  0xee   :  { %v294_v57 = vadd.f32 %v1800_v56, %v2131_v25  ;;  %v285_v58 = vpop.f32.mrb[9].mxu0  ;;  %1902 = vmatprep.subr.bf16.mxu1 %v1964_v51 }
  0xef   :  { %v286_v60 = vadd.f32 %v2131_v25, %v285_v58  ;;  %v1801_v61 = vpop.f32.mrb[10].mxu0  ;;  %1834 = vmatprep.mubr.msk.bf16.mxu1 %vm467_vm1, %v414_v55 }
  0xf0   :  { %v297_v62 = vadd.f32 %v1801_v61, %v2131_v25  ;;  %v288_v63 = vpop.f32.mrb[11].mxu0  ;;  %1835 = vmatmul.mubr.msk.bf16.gmra.mrb[4].mxu1 %vm467_vm1, %v415_v54  ;;  %v390_v1 = vmax.f32 %v294_v57, 0.0 }
  0xf1   :  { %v289_v0 = vadd.f32 %v2131_v25, %v288_v63  ;;  %1903 = vmatpush3.bf16.msra.mxu1 %v1964_v51  ;;  %v388_v3 = vmax.f32 %v286_v60, 0.0 }
  0xf2   :  { %v391_v2 = vmax.f32 %v297_v62, 0.0  ;;  %1904 = vmatprep.subr.bf16.mxu1 %v1965_v59 }
  0xf3   :  { %v389_v4 = vmax.f32 %v289_v0, 0.0 }
  0xf4   :  { %v417_v5 = vpack.c.bf16 %v391_v2, %v390_v1 }
  0xf5   :  { %v416_v6 = vpack.c.bf16 %v389_v4, %v388_v3  ;;  %v1804_v7 = vpop.f32.mrb[12].mxu0  ;;  %1905 = vmatpush3.bf16.msra.mxu1 %v1965_v59 }
  0xf6   :  { %v310_v8 = vadd.f32 %v1804_v7, %v2131_v25  ;;  %v301_v9 = vpop.f32.mrb[13].mxu0 }
  0xf7   :  { %v302_v10 = vadd.f32 %v2131_v25, %v301_v9  ;;  %v1805_v11 = vpop.f32.mrb[14].mxu0  ;;  %1838 = vmatprep.mubr.msk.bf16.mxu1 %vm467_vm1, %v416_v6 }
  0xf8   :  { %v313_v12 = vadd.f32 %v1805_v11, %v2131_v25  ;;  %v304_v13 = vpop.f32.mrb[15].mxu0  ;;  %1839 = vmatmul.mubr.msk.bf16.gmra.mrb[8].mxu1 %vm467_vm1, %v417_v5  ;;  %v394_v15 = vmax.f32 %v310_v8, 0.0 }
  0xf9   :  { %v305_v14 = vadd.f32 %v2131_v25, %v304_v13  ;;  %v392_v17 = vmax.f32 %v302_v10, 0.0 }
  0xfa   :  { %v395_v16 = vmax.f32 %v313_v12, 0.0  ;;  %v2191_v12 = vld [vmem:[%s2579_s6] ss:$0 sm:$0xff] }
  0xfb   :  { %v393_v18 = vmax.f32 %v305_v14, 0.0 }
  0xfc   :  { %v419_v19 = vpack.c.bf16 %v395_v16, %v394_v15 }
  0xfd   :  { %v418_v20 = vpack.c.bf16 %v393_v18, %v392_v17  ;;  %v1808_v21 = vpop.f32.mrb[16].mxu0 }
  0xfe   :  { %v326_v22 = vadd.f32 %v1808_v21, %v2131_v25  ;;  %v317_v23 = vpop.f32.mrb[17].mxu0 }
  0xff   :  { %v318_v24 = vadd.f32 %v2131_v25, %v317_v23  ;;  %v1809_v26 = vpop.f32.mrb[18].mxu0  ;;  %1842 = vmatprep.mubr.msk.bf16.mxu1 %vm467_vm1, %v418_v20 }
 0x100   :  { %v329_v27 = vadd.f32 %v1809_v26, %v2131_v25  ;;  %v320_v28 = vpop.f32.mrb[19].mxu0  ;;  %1843 = vmatmul.mubr.msk.bf16.gmra.mrb[12].mxu1 %vm467_vm1, %v419_v19  ;;  %v398_v30 = vmax.f32 %v326_v22, 0.0 }
 0x101   :  { %v321_v29 = vadd.f32 %v2131_v25, %v320_v28  ;;  %v396_v32 = vmax.f32 %v318_v24, 0.0 }
 0x102   :  { %v399_v31 = vmax.f32 %v329_v27, 0.0 }
 0x103   :  { %v397_v33 = vmax.f32 %v321_v29, 0.0 }
 0x104   :  { %v421_v34 = vpack.c.bf16 %v399_v31, %v398_v30 }
 0x105   :  { %v420_v35 = vpack.c.bf16 %v397_v33, %v396_v32  ;;  %v1812_v36 = vpop.f32.mrb[20].mxu0 }
 0x106   :  { %v342_v37 = vadd.f32 %v1812_v36, %v2131_v25  ;;  %v333_v38 = vpop.f32.mrb[21].mxu0 }
 0x107   :  { %v334_v39 = vadd.f32 %v2131_v25, %v333_v38  ;;  %v1813_v40 = vpop.f32.mrb[22].mxu0  ;;  %1846 = vmatprep.mubr.msk.bf16.mxu1 %vm467_vm1, %v420_v35 }
 0x108   :  { %v345_v41 = vadd.f32 %v1813_v40, %v2131_v25  ;;  %v336_v42 = vpop.f32.mrb[23].mxu0  ;;  %1847 = vmatmul.mubr.msk.bf16.gmra.mrb[16].mxu1 %vm467_vm1, %v421_v34  ;;  %v402_v44 = vmax.f32 %v342_v37, 0.0 }
 0x109   :  { %v337_v43 = vadd.f32 %v2131_v25, %v336_v42  ;;  %v400_v46 = vmax.f32 %v334_v39, 0.0 }
 0x10a   :  { %v403_v45 = vmax.f32 %v345_v41, 0.0 }
 0x10b   :  { %v401_v47 = vmax.f32 %v337_v43, 0.0 }
 0x10c   :  { %v423_v48 = vpack.c.bf16 %v403_v45, %v402_v44 }
 0x10d   :  { %v422_v49 = vpack.c.bf16 %v401_v47, %v400_v46  ;;  %v1816_v50 = vpop.f32.mrb[24].mxu0 }
 0x10e   :  { %v358_v51 = vadd.f32 %v1816_v50, %v2131_v25  ;;  %v349_v52 = vpop.f32.mrb[25].mxu0 }
 0x10f   :  { %v350_v53 = vadd.f32 %v2131_v25, %v349_v52  ;;  %v1817_v54 = vpop.f32.mrb[26].mxu0  ;;  %1850 = vmatprep.mubr.msk.bf16.mxu1 %vm467_vm1, %v422_v49 }
 0x110   :  { %v361_v55 = vadd.f32 %v1817_v54, %v2131_v25  ;;  %v352_v56 = vpop.f32.mrb[27].mxu0  ;;  %1851 = vmatmul.mubr.msk.bf16.gmra.mrb[20].mxu1 %vm467_vm1, %v423_v48  ;;  %v406_v58 = vmax.f32 %v358_v51, 0.0 }
 0x111   :  { %v353_v57 = vadd.f32 %v2131_v25, %v352_v56  ;;  %v404_v60 = vmax.f32 %v350_v53, 0.0 }
 0x112   :  { %v407_v59 = vmax.f32 %v361_v55, 0.0 }
 0x113   :  { %v405_v61 = vmax.f32 %v353_v57, 0.0 }
 0x114   :  { %v425_v62 = vpack.c.bf16 %v407_v59, %v406_v58 }
 0x115   :  { %v424_v63 = vpack.c.bf16 %v405_v61, %v404_v60  ;;  %v1820_v0 = vpop.f32.mrb[28].mxu0 }
 0x116   :  { %v374_v1 = vadd.f32 %v1820_v0, %v2131_v25  ;;  %v365_v2 = vpop.f32.mrb[29].mxu0 }
 0x117   :  { %v366_v3 = vadd.f32 %v2131_v25, %v365_v2  ;;  %v1821_v4 = vpop.f32.mrb[30].mxu0  ;;  %1854 = vmatprep.mubr.msk.bf16.mxu1 %vm467_vm1, %v424_v63 }
 0x118   :  { %v377_v5 = vadd.f32 %v1821_v4, %v2131_v25  ;;  %v368_v6 = vpop.f32.mrb[31].mxu0  ;;  %1855 = vmatmul.mubr.msk.bf16.gmra.mrb[24].mxu1 %vm467_vm1, %v425_v62  ;;  %v410_v8 = vmax.f32 %v374_v1, 0.0 }
 0x119   :  { %v369_v7 = vadd.f32 %v2131_v25, %v368_v6  ;;  %v408_v10 = vmax.f32 %v366_v3, 0.0 }
 0x11a   :  { %v411_v9 = vmax.f32 %v377_v5, 0.0 }
 0x11b   :  { %v409_v11 = vmax.f32 %v369_v7, 0.0 }
 0x11c   :  { %v427_v13 = vpack.c.bf16 %v411_v9, %v410_v8 }
 0x11d   :  { %v426_v14 = vpack.c.bf16 %v409_v11, %v408_v10  ;;  %v1868_v15 = vpop.f32.mrb[32].mxu0 }
 0x11e   :  { %v904_v16 = vadd.f32 %v1868_v15, %v2191_v12  ;;  %v895_v17 = vpop.f32.mrb[33].mxu0 }
 0x11f   :  { %v896_v18 = vadd.f32 %v2191_v12, %v895_v17  ;;  %1858 = vmatprep.mubr.msk.bf16.mxu1 %vm467_vm1, %v426_v14  ;;  %v1869_v25 = vpop.f32.mrb[34].mxu0 }
 0x120   :  { %v907_v19 = vadd.f32 %v1869_v25, %v2191_v12  ;;  %1859 = vmatmul.mubr.msk.bf16.gmra.mrb[28].mxu1 %vm467_vm1, %v427_v13  ;;  %v898_v20 = vpop.f32.mrb[35].mxu0  ;;  %v1024_v22 = vmax.f32 %v904_v16, 0.0 }
 0x121   :  { %v899_v21 = vadd.f32 %v2191_v12, %v898_v20  ;;  %v1022_v24 = vmax.f32 %v896_v18, 0.0 }
 0x122   :  { %v1025_v23 = vmax.f32 %v907_v19, 0.0 }
 0x123   :  { %v1023_v26 = vmax.f32 %v899_v21, 0.0 }
 0x124   :  { %v1055_v27 = vpack.c.bf16 %v1025_v23, %v1024_v22 }
 0x125   :  { %v1054_v28 = vpack.c.bf16 %v1023_v26, %v1022_v24  ;;  %v1872_v29 = vpop.f32.mrb[36].mxu0 }
 0x126   :  { %v920_v30 = vadd.f32 %v1872_v29, %v2191_v12  ;;  %v911_v31 = vpop.f32.mrb[37].mxu0 }
 0x127   :  { %v912_v32 = vadd.f32 %v2191_v12, %v911_v31  ;;  %v1873_v33 = vpop.f32.mrb[38].mxu0  ;;  %1906 = vmatprep.mubr.msk.bf16.mxu1 %vm467_vm1, %v1054_v28 }
 0x128   :  { %v923_v34 = vadd.f32 %v1873_v33, %v2191_v12  ;;  %v914_v35 = vpop.f32.mrb[39].mxu0  ;;  %1907 = vmatmul.mubr.msk.bf16.vlgmr.msra.gmra.mrb[32].mxu1 %vm467_vm1, %v1055_v27  ;;  %v1028_v37 = vmax.f32 %v920_v30, 0.0 }
 0x129   :  { %v915_v36 = vadd.f32 %v2191_v12, %v914_v35  ;;  %v1026_v39 = vmax.f32 %v912_v32, 0.0 }
 0x12a   :  { %v1029_v38 = vmax.f32 %v923_v34, 0.0 }
 0x12b   :  { %v1027_v40 = vmax.f32 %v915_v36, 0.0 }
 0x12c   :  { %v1057_v41 = vpack.c.bf16 %v1029_v38, %v1028_v37 }
 0x12d   :  { %v1056_v42 = vpack.c.bf16 %v1027_v40, %v1026_v39  ;;  %v1876_v43 = vpop.f32.mrb[40].mxu0 }
 0x12e   :  { %v936_v44 = vadd.f32 %v1876_v43, %v2191_v12  ;;  %v927_v45 = vpop.f32.mrb[41].mxu0 }
 0x12f   :  { %v928_v46 = vadd.f32 %v2191_v12, %v927_v45  ;;  %v1877_v47 = vpop.f32.mrb[42].mxu0  ;;  %1910 = vmatprep.mubr.msk.bf16.mxu1 %vm467_vm1, %v1056_v42 }
 0x130   :  { %v939_v48 = vadd.f32 %v1877_v47, %v2191_v12  ;;  %v930_v49 = vpop.f32.mrb[43].mxu0  ;;  %1911 = vmatmul.mubr.msk.bf16.gmra.mrb[36].mxu1 %vm467_vm1, %v1057_v41  ;;  %v1032_v51 = vmax.f32 %v936_v44, 0.0 }
 0x131   :  { %v931_v50 = vadd.f32 %v2191_v12, %v930_v49  ;;  %v1030_v53 = vmax.f32 %v928_v46, 0.0 }
 0x132   :  { %v1033_v52 = vmax.f32 %v939_v48, 0.0 }
 0x133   :  { %v1031_v54 = vmax.f32 %v931_v50, 0.0 }
 0x134   :  { %v1059_v55 = vpack.c.bf16 %v1033_v52, %v1032_v51 }
 0x135   :  { %v1058_v56 = vpack.c.bf16 %v1031_v54, %v1030_v53  ;;  %v1880_v57 = vpop.f32.mrb[44].mxu0 }
 0x136   :  { %v952_v58 = vadd.f32 %v1880_v57, %v2191_v12  ;;  %v943_v59 = vpop.f32.mrb[45].mxu0 }
 0x137   :  { %v944_v60 = vadd.f32 %v2191_v12, %v943_v59  ;;  %v1881_v61 = vpop.f32.mrb[46].mxu0  ;;  %1914 = vmatprep.mubr.msk.bf16.mxu1 %vm467_vm1, %v1058_v56 }
 0x138   :  { %v955_v62 = vadd.f32 %v1881_v61, %v2191_v12  ;;  %v946_v63 = vpop.f32.mrb[47].mxu0  ;;  %1915 = vmatmul.mubr.msk.bf16.gmra.mrb[40].mxu1 %vm467_vm1, %v1059_v55  ;;  %v1036_v1 = vmax.f32 %v952_v58, 0.0 }
 0x139   :  { %v947_v0 = vadd.f32 %v2191_v12, %v946_v63  ;;  %v1034_v3 = vmax.f32 %v944_v60, 0.0 }
 0x13a   :  { %v1037_v2 = vmax.f32 %v955_v62, 0.0 }
 0x13b   :  { %v1035_v4 = vmax.f32 %v947_v0, 0.0  ;;  %v2246_v0 = vld [vmem:[%s2580_s4] ss:$0 sm:$0xff] }
 0x13c   :  { %v1061_v5 = vpack.c.bf16 %v1037_v2, %v1036_v1 }
 0x13d   :  { %v1060_v6 = vpack.c.bf16 %v1035_v4, %v1034_v3  ;;  %v1884_v7 = vpop.f32.mrb[48].mxu0 }
 0x13e   :  { %v968_v8 = vadd.f32 %v1884_v7, %v2191_v12  ;;  %v959_v9 = vpop.f32.mrb[49].mxu0 }
 0x13f   :  { %v960_v10 = vadd.f32 %v2191_v12, %v959_v9  ;;  %v1885_v11 = vpop.f32.mrb[50].mxu0  ;;  %1918 = vmatprep.mubr.msk.bf16.mxu1 %vm467_vm1, %v1060_v6 }
 0x140   :  { %v971_v13 = vadd.f32 %v1885_v11, %v2191_v12  ;;  %v962_v14 = vpop.f32.mrb[51].mxu0  ;;  %1919 = vmatmul.mubr.msk.bf16.gmra.mrb[44].mxu1 %vm467_vm1, %v1061_v5  ;;  %v1040_v16 = vmax.f32 %v968_v8, 0.0 }
 0x141   :  { %v963_v15 = vadd.f32 %v2191_v12, %v962_v14  ;;  %v1038_v18 = vmax.f32 %v960_v10, 0.0 }
 0x142   :  { %v1041_v17 = vmax.f32 %v971_v13, 0.0 }
 0x143   :  { %v1039_v25 = vmax.f32 %v963_v15, 0.0 }
 0x144   :  { %v1063_v19 = vpack.c.bf16 %v1041_v17, %v1040_v16 }
 0x145   :  { %v1062_v20 = vpack.c.bf16 %v1039_v25, %v1038_v18  ;;  %v1888_v21 = vpop.f32.mrb[52].mxu0 }
 0x146   :  { %v984_v22 = vadd.f32 %v1888_v21, %v2191_v12  ;;  %v975_v23 = vpop.f32.mrb[53].mxu0 }
 0x147   :  { %v976_v24 = vadd.f32 %v2191_v12, %v975_v23  ;;  %v1889_v26 = vpop.f32.mrb[54].mxu0  ;;  %1922 = vmatprep.mubr.msk.bf16.mxu1 %vm467_vm1, %v1062_v20 }
 0x148   :  { %v987_v27 = vadd.f32 %v1889_v26, %v2191_v12  ;;  %v978_v28 = vpop.f32.mrb[55].mxu0  ;;  %1923 = vmatmul.mubr.msk.bf16.gmra.mrb[48].mxu1 %vm467_vm1, %v1063_v19  ;;  %v1044_v30 = vmax.f32 %v984_v22, 0.0 }
 0x149   :  { %v979_v29 = vadd.f32 %v2191_v12, %v978_v28  ;;  %v1042_v32 = vmax.f32 %v976_v24, 0.0 }
 0x14a   :  { %v1045_v31 = vmax.f32 %v987_v27, 0.0 }
 0x14b   :  { %v1043_v33 = vmax.f32 %v979_v29, 0.0 }
 0x14c   :  { %v1065_v34 = vpack.c.bf16 %v1045_v31, %v1044_v30 }
 0x14d   :  { %v1064_v35 = vpack.c.bf16 %v1043_v33, %v1042_v32  ;;  %v1892_v36 = vpop.f32.mrb[56].mxu0 }
 0x14e   :  { %v1000_v37 = vadd.f32 %v1892_v36, %v2191_v12  ;;  %v991_v38 = vpop.f32.mrb[57].mxu0 }
 0x14f   :  { %v992_v39 = vadd.f32 %v2191_v12, %v991_v38  ;;  %v1893_v40 = vpop.f32.mrb[58].mxu0  ;;  %1926 = vmatprep.mubr.msk.bf16.mxu1 %vm467_vm1, %v1064_v35 }
 0x150   :  { %v1003_v41 = vadd.f32 %v1893_v40, %v2191_v12  ;;  %v994_v42 = vpop.f32.mrb[59].mxu0  ;;  %1927 = vmatmul.mubr.msk.bf16.gmra.mrb[52].mxu1 %vm467_vm1, %v1065_v34  ;;  %v1048_v44 = vmax.f32 %v1000_v37, 0.0 }
 0x151   :  { %v995_v43 = vadd.f32 %v2191_v12, %v994_v42  ;;  %v1046_v46 = vmax.f32 %v992_v39, 0.0 }
 0x152   :  { %v1049_v45 = vmax.f32 %v1003_v41, 0.0 }
 0x153   :  { %v1047_v47 = vmax.f32 %v995_v43, 0.0 }
 0x154   :  { %v1067_v48 = vpack.c.bf16 %v1049_v45, %v1048_v44 }
 0x155   :  { %v1066_v49 = vpack.c.bf16 %v1047_v47, %v1046_v46  ;;  %v1896_v50 = vpop.f32.mrb[60].mxu0 }
 0x156   :  { %v1016_v51 = vadd.f32 %v1896_v50, %v2191_v12  ;;  %v1007_v52 = vpop.f32.mrb[61].mxu0 }
 0x157   :  { %v1008_v53 = vadd.f32 %v2191_v12, %v1007_v52  ;;  %v1897_v54 = vpop.f32.mrb[62].mxu0  ;;  %1930 = vmatprep.mubr.msk.bf16.mxu1 %vm467_vm1, %v1066_v49 }
 0x158   :  { %v1019_v55 = vadd.f32 %v1897_v54, %v2191_v12  ;;  %v1010_v56 = vpop.f32.mrb[63].mxu0  ;;  %1931 = vmatmul.mubr.msk.bf16.gmra.mrb[56].mxu1 %vm467_vm1, %v1067_v48  ;;  %v1052_v58 = vmax.f32 %v1016_v51, 0.0 }
 0x159   :  { %v1011_v57 = vadd.f32 %v2191_v12, %v1010_v56  ;;  %v1050_v60 = vmax.f32 %v1008_v53, 0.0 }
 0x15a   :  { %v1053_v59 = vmax.f32 %v1019_v55, 0.0 }
 0x15b   :  { %v1051_v61 = vmax.f32 %v1011_v57, 0.0 }
 0x15c   :  { %v1069_v62 = vpack.c.bf16 %v1053_v59, %v1052_v58 }
 0x15d   :  { %v1068_v63 = vpack.c.bf16 %v1051_v61, %v1050_v60 }
 0x15f   :  { %1934 = vmatprep.mubr.msk.bf16.mxu1 %vm467_vm1, %v1068_v63 }
 0x160   :  { %1935 = vmatmul.mubr.msk.bf16.gmra.mrb[60].mxu1 %vm467_vm1, %v1069_v62 }
 0x1bb   :  { %v1832_v1 = vpop.f32.mrb[0].mxu1 }
 0x1bc   :  { %v559_v2 = vadd.f32 %v1832_v1, %v2246_v0  ;;  %v550_v3 = vpop.f32.mrb[1].mxu1 }
 0x1bd   :  { %v551_v12 = vadd.f32 %v2246_v0, %v550_v3  ;;  %v1833_v4 = vpop.f32.mrb[2].mxu1 }
 0x1be   :  { %v1648_v5 = vpack.c.bf16 %v559_v2, %v559_v2  ;;  %v562_v6 = vadd.f32 %v1833_v4, %v2246_v0  ;;  %v553_v7 = vpop.f32.mrb[3].mxu1 }
 0x1bf   :  { %v1646_v8 = vpack.c.bf16 %v551_v12, %v551_v12  ;;  %v554_v9 = vadd.f32 %v2246_v0, %v553_v7 }
 0x1c0   :  { %808 = vst.msk [vmem:[%s2581_s9 + $0x8] sm:$0xf] %vm805_vm2, %v1648_v5  ;;  %v1649_v10 = vpack.c.bf16 %v562_v6, %v562_v6 }
 0x1c1   :  { %806 = vst.msk [vmem:[%s2581_s9] sm:$0xf] %vm805_vm2, %v1646_v8  ;;  %v1647_v11 = vpack.c.bf16 %v554_v9, %v554_v9 }
 0x1c2   :  { %809 = vst.msk [vmem:[%s2581_s9 + $0xc] sm:$0xf] %vm805_vm2, %v1649_v10 }
 0x1c3   :  { %807 = vst.msk [vmem:[%s2581_s9 + $0x4] sm:$0xf] %vm805_vm2, %v1647_v11  ;;  %v1836_v13 = vpop.f32.mrb[4].mxu1 }
 0x1c4   :  { %v575_v14 = vadd.f32 %v1836_v13, %v2246_v0  ;;  %v566_v15 = vpop.f32.mrb[5].mxu1 }
 0x1c5   :  { %v567_v16 = vadd.f32 %v2246_v0, %v566_v15  ;;  %v1837_v17 = vpop.f32.mrb[6].mxu1 }
 0x1c6   :  { %v1652_v18 = vpack.c.bf16 %v575_v14, %v575_v14  ;;  %v578_v25 = vadd.f32 %v1837_v17, %v2246_v0  ;;  %v569_v19 = vpop.f32.mrb[7].mxu1 }
 0x1c7   :  { %v1650_v20 = vpack.c.bf16 %v567_v16, %v567_v16  ;;  %v570_v21 = vadd.f32 %v2246_v0, %v569_v19 }
 0x1c8   :  { %812 = vst.msk [vmem:[%s2581_s9 + $0x18] sm:$0xf] %vm805_vm2, %v1652_v18  ;;  %v1653_v22 = vpack.c.bf16 %v578_v25, %v578_v25 }
 0x1c9   :  { %810 = vst.msk [vmem:[%s2581_s9 + $0x10] sm:$0xf] %vm805_vm2, %v1650_v20  ;;  %v1651_v23 = vpack.c.bf16 %v570_v21, %v570_v21 }
 0x1ca   :  { %813 = vst.msk [vmem:[%s2581_s9 + $0x1c] sm:$0xf] %vm805_vm2, %v1653_v22 }
 0x1cb   :  { %811 = vst.msk [vmem:[%s2581_s9 + $0x14] sm:$0xf] %vm805_vm2, %v1651_v23  ;;  %v1840_v24 = vpop.f32.mrb[8].mxu1 }
 0x1cc   :  { %v591_v26 = vadd.f32 %v1840_v24, %v2246_v0  ;;  %v582_v27 = vpop.f32.mrb[9].mxu1 }
 0x1cd   :  { %v583_v28 = vadd.f32 %v2246_v0, %v582_v27  ;;  %v1841_v29 = vpop.f32.mrb[10].mxu1 }
 0x1ce   :  { %v1656_v30 = vpack.c.bf16 %v591_v26, %v591_v26  ;;  %v594_v31 = vadd.f32 %v1841_v29, %v2246_v0  ;;  %v585_v32 = vpop.f32.mrb[11].mxu1 }
 0x1cf   :  { %v1654_v33 = vpack.c.bf16 %v583_v28, %v583_v28  ;;  %v586_v34 = vadd.f32 %v2246_v0, %v585_v32 }
 0x1d0   :  { %816 = vst.msk [vmem:[%s2581_s9 + $0x28] sm:$0xf] %vm805_vm2, %v1656_v30  ;;  %v1657_v35 = vpack.c.bf16 %v594_v31, %v594_v31 }
 0x1d1   :  { %814 = vst.msk [vmem:[%s2581_s9 + $0x20] sm:$0xf] %vm805_vm2, %v1654_v33  ;;  %v1655_v36 = vpack.c.bf16 %v586_v34, %v586_v34  ;;  %v2403_v34 = vld [vmem:[%s2582_s8] ss:$0 sm:$0xff] }
 0x1d2   :  { %817 = vst.msk [vmem:[%s2581_s9 + $0x2c] sm:$0xf] %vm805_vm2, %v1657_v35 }
 0x1d3   :  { %815 = vst.msk [vmem:[%s2581_s9 + $0x24] sm:$0xf] %vm805_vm2, %v1655_v36  ;;  %v1844_v37 = vpop.f32.mrb[12].mxu1 }
 0x1d4   :  { %v607_v38 = vadd.f32 %v1844_v37, %v2246_v0  ;;  %v598_v39 = vpop.f32.mrb[13].mxu1 }
 0x1d5   :  { %v599_v40 = vadd.f32 %v2246_v0, %v598_v39  ;;  %v1845_v41 = vpop.f32.mrb[14].mxu1 }
 0x1d6   :  { %v1660_v42 = vpack.c.bf16 %v607_v38, %v607_v38  ;;  %v610_v43 = vadd.f32 %v1845_v41, %v2246_v0  ;;  %v601_v44 = vpop.f32.mrb[15].mxu1 }
 0x1d7   :  { %v1658_v45 = vpack.c.bf16 %v599_v40, %v599_v40  ;;  %v602_v46 = vadd.f32 %v2246_v0, %v601_v44 }
 0x1d8   :  { %820 = vst.msk [vmem:[%s2581_s9 + $0x38] sm:$0xf] %vm805_vm2, %v1660_v42  ;;  %v1661_v47 = vpack.c.bf16 %v610_v43, %v610_v43 }
 0x1d9   :  { %818 = vst.msk [vmem:[%s2581_s9 + $0x30] sm:$0xf] %vm805_vm2, %v1658_v45  ;;  %v1659_v48 = vpack.c.bf16 %v602_v46, %v602_v46 }
 0x1da   :  { %821 = vst.msk [vmem:[%s2581_s9 + $0x3c] sm:$0xf] %vm805_vm2, %v1661_v47 }
 0x1db   :  { %819 = vst.msk [vmem:[%s2581_s9 + $0x34] sm:$0xf] %vm805_vm2, %v1659_v48  ;;  %v1848_v49 = vpop.f32.mrb[16].mxu1 }
 0x1dc   :  { %v623_v50 = vadd.f32 %v1848_v49, %v2246_v0  ;;  %v614_v51 = vpop.f32.mrb[17].mxu1 }
 0x1dd   :  { %v615_v52 = vadd.f32 %v2246_v0, %v614_v51  ;;  %v1849_v53 = vpop.f32.mrb[18].mxu1 }
 0x1de   :  { %v1664_v54 = vpack.c.bf16 %v623_v50, %v623_v50  ;;  %v626_v55 = vadd.f32 %v1849_v53, %v2246_v0  ;;  %v617_v56 = vpop.f32.mrb[19].mxu1 }
 0x1df   :  { %v1662_v57 = vpack.c.bf16 %v615_v52, %v615_v52  ;;  %v618_v58 = vadd.f32 %v2246_v0, %v617_v56 }
 0x1e0   :  { %824 = vst.msk [vmem:[%s2581_s9 + $0x48] sm:$0xf] %vm805_vm2, %v1664_v54  ;;  %v1665_v59 = vpack.c.bf16 %v626_v55, %v626_v55 }
 0x1e1   :  { %822 = vst.msk [vmem:[%s2581_s9 + $0x40] sm:$0xf] %vm805_vm2, %v1662_v57  ;;  %v1663_v60 = vpack.c.bf16 %v618_v58, %v618_v58 }
 0x1e2   :  { %825 = vst.msk [vmem:[%s2581_s9 + $0x4c] sm:$0xf] %vm805_vm2, %v1665_v59 }
 0x1e3   :  { %823 = vst.msk [vmem:[%s2581_s9 + $0x44] sm:$0xf] %vm805_vm2, %v1663_v60  ;;  %v1852_v61 = vpop.f32.mrb[20].mxu1 }
 0x1e4   :  { %v639_v62 = vadd.f32 %v1852_v61, %v2246_v0  ;;  %v630_v63 = vpop.f32.mrb[21].mxu1 }
 0x1e5   :  { %v631_v1 = vadd.f32 %v2246_v0, %v630_v63  ;;  %v1853_v2 = vpop.f32.mrb[22].mxu1 }
 0x1e6   :  { %v1668_v3 = vpack.c.bf16 %v639_v62, %v639_v62  ;;  %v642_v12 = vadd.f32 %v1853_v2, %v2246_v0  ;;  %v633_v4 = vpop.f32.mrb[23].mxu1 }
 0x1e7   :  { %v1666_v5 = vpack.c.bf16 %v631_v1, %v631_v1  ;;  %v634_v6 = vadd.f32 %v2246_v0, %v633_v4 }
 0x1e8   :  { %828 = vst.msk [vmem:[%s2581_s9 + $0x58] sm:$0xf] %vm805_vm2, %v1668_v3  ;;  %v1669_v7 = vpack.c.bf16 %v642_v12, %v642_v12 }
 0x1e9   :  { %826 = vst.msk [vmem:[%s2581_s9 + $0x50] sm:$0xf] %vm805_vm2, %v1666_v5  ;;  %v1667_v8 = vpack.c.bf16 %v634_v6, %v634_v6 }
 0x1ea   :  { %829 = vst.msk [vmem:[%s2581_s9 + $0x5c] sm:$0xf] %vm805_vm2, %v1669_v7 }
 0x1eb   :  { %827 = vst.msk [vmem:[%s2581_s9 + $0x54] sm:$0xf] %vm805_vm2, %v1667_v8  ;;  %v1856_v9 = vpop.f32.mrb[24].mxu1 }
 0x1ec   :  { %v655_v10 = vadd.f32 %v1856_v9, %v2246_v0  ;;  %v646_v11 = vpop.f32.mrb[25].mxu1 }
 0x1ed   :  { %v647_v13 = vadd.f32 %v2246_v0, %v646_v11  ;;  %v1857_v14 = vpop.f32.mrb[26].mxu1 }
 0x1ee   :  { %v1672_v15 = vpack.c.bf16 %v655_v10, %v655_v10  ;;  %v658_v16 = vadd.f32 %v1857_v14, %v2246_v0  ;;  %v649_v17 = vpop.f32.mrb[27].mxu1 }
 0x1ef   :  { %v1670_v18 = vpack.c.bf16 %v647_v13, %v647_v13  ;;  %v650_v25 = vadd.f32 %v2246_v0, %v649_v17 }
 0x1f0   :  { %832 = vst.msk [vmem:[%s2581_s9 + $0x68] sm:$0xf] %vm805_vm2, %v1672_v15  ;;  %v1673_v19 = vpack.c.bf16 %v658_v16, %v658_v16 }
 0x1f1   :  { %830 = vst.msk [vmem:[%s2581_s9 + $0x60] sm:$0xf] %vm805_vm2, %v1670_v18  ;;  %v1671_v20 = vpack.c.bf16 %v650_v25, %v650_v25 }
 0x1f2   :  { %833 = vst.msk [vmem:[%s2581_s9 + $0x6c] sm:$0xf] %vm805_vm2, %v1673_v19 }
 0x1f3   :  { %831 = vst.msk [vmem:[%s2581_s9 + $0x64] sm:$0xf] %vm805_vm2, %v1671_v20  ;;  %v1860_v21 = vpop.f32.mrb[28].mxu1 }
 0x1f4   :  { %v671_v22 = vadd.f32 %v1860_v21, %v2246_v0  ;;  %v662_v23 = vpop.f32.mrb[29].mxu1 }
 0x1f5   :  { %v663_v24 = vadd.f32 %v2246_v0, %v662_v23  ;;  %v1861_v26 = vpop.f32.mrb[30].mxu1 }
 0x1f6   :  { %v1676_v27 = vpack.c.bf16 %v671_v22, %v671_v22  ;;  %v674_v28 = vadd.f32 %v1861_v26, %v2246_v0  ;;  %v665_v29 = vpop.f32.mrb[31].mxu1 }
 0x1f7   :  { %v1674_v30 = vpack.c.bf16 %v663_v24, %v663_v24  ;;  %v666_v31 = vadd.f32 %v2246_v0, %v665_v29 }
 0x1f8   :  { %836 = vst.msk [vmem:[%s2581_s9 + $0x78] sm:$0xf] %vm805_vm2, %v1676_v27  ;;  %v1677_v32 = vpack.c.bf16 %v674_v28, %v674_v28 }
 0x1f9   :  { %834 = vst.msk [vmem:[%s2581_s9 + $0x70] sm:$0xf] %vm805_vm2, %v1674_v30  ;;  %v1675_v33 = vpack.c.bf16 %v666_v31, %v666_v31 }
 0x1fa   :  { %837 = vst.msk [vmem:[%s2581_s9 + $0x7c] sm:$0xf] %vm805_vm2, %v1677_v32 }
 0x1fb   :  { %835 = vst.msk [vmem:[%s2581_s9 + $0x74] sm:$0xf] %vm805_vm2, %v1675_v33  ;;  %v1908_v0 = vpop.f32.mrb[32].mxu1 }
 0x1fc   :  { %v1200_v35 = vadd.f32 %v1908_v0, %v2403_v34  ;;  %v1191_v36 = vpop.f32.mrb[33].mxu1 }
 0x1fd   :  { %v1192_v37 = vadd.f32 %v2403_v34, %v1191_v36  ;;  %v1909_v38 = vpop.f32.mrb[34].mxu1 }
 0x1fe   :  { %v1680_v39 = vpack.c.bf16 %v1200_v35, %v1200_v35  ;;  %v1203_v40 = vadd.f32 %v1909_v38, %v2403_v34  ;;  %v1194_v41 = vpop.f32.mrb[35].mxu1 }
 0x1ff   :  { %v1678_v42 = vpack.c.bf16 %v1192_v37, %v1192_v37  ;;  %v1195_v43 = vadd.f32 %v2403_v34, %v1194_v41 }
 0x200   :  { %1448 = vst.msk [vmem:[%s2583_s10 + $0x8] sm:$0xf] %vm805_vm2, %v1680_v39  ;;  %v1681_v44 = vpack.c.bf16 %v1203_v40, %v1203_v40 }
 0x201   :  { %1446 = vst.msk [vmem:[%s2583_s10] sm:$0xf] %vm805_vm2, %v1678_v42  ;;  %v1679_v45 = vpack.c.bf16 %v1195_v43, %v1195_v43 }
 0x202   :  { %1449 = vst.msk [vmem:[%s2583_s10 + $0xc] sm:$0xf] %vm805_vm2, %v1681_v44 }
 0x203   :  { %1447 = vst.msk [vmem:[%s2583_s10 + $0x4] sm:$0xf] %vm805_vm2, %v1679_v45  ;;  %v1912_v46 = vpop.f32.mrb[36].mxu1 }
 0x204   :  { %v1216_v47 = vadd.f32 %v1912_v46, %v2403_v34  ;;  %v1207_v48 = vpop.f32.mrb[37].mxu1 }
 0x205   :  { %v1208_v49 = vadd.f32 %v2403_v34, %v1207_v48  ;;  %v1913_v50 = vpop.f32.mrb[38].mxu1 }
 0x206   :  { %v1684_v51 = vpack.c.bf16 %v1216_v47, %v1216_v47  ;;  %v1219_v52 = vadd.f32 %v1913_v50, %v2403_v34  ;;  %v1210_v53 = vpop.f32.mrb[39].mxu1 }
 0x207   :  { %v1682_v54 = vpack.c.bf16 %v1208_v49, %v1208_v49  ;;  %v1211_v55 = vadd.f32 %v2403_v34, %v1210_v53 }
 0x208   :  { %1452 = vst.msk [vmem:[%s2583_s10 + $0x18] sm:$0xf] %vm805_vm2, %v1684_v51  ;;  %v1685_v56 = vpack.c.bf16 %v1219_v52, %v1219_v52 }
 0x209   :  { %1450 = vst.msk [vmem:[%s2583_s10 + $0x10] sm:$0xf] %vm805_vm2, %v1682_v54  ;;  %v1683_v57 = vpack.c.bf16 %v1211_v55, %v1211_v55 }
 0x20a   :  { %1453 = vst.msk [vmem:[%s2583_s10 + $0x1c] sm:$0xf] %vm805_vm2, %v1685_v56 }
 0x20b   :  { %1451 = vst.msk [vmem:[%s2583_s10 + $0x14] sm:$0xf] %vm805_vm2, %v1683_v57  ;;  %v1916_v58 = vpop.f32.mrb[40].mxu1 }
 0x20c   :  { %v1232_v59 = vadd.f32 %v1916_v58, %v2403_v34  ;;  %v1223_v60 = vpop.f32.mrb[41].mxu1 }
 0x20d   :  { %v1224_v61 = vadd.f32 %v2403_v34, %v1223_v60  ;;  %v1917_v62 = vpop.f32.mrb[42].mxu1 }
 0x20e   :  { %v1688_v63 = vpack.c.bf16 %v1232_v59, %v1232_v59  ;;  %v1235_v1 = vadd.f32 %v1917_v62, %v2403_v34  ;;  %v1226_v2 = vpop.f32.mrb[43].mxu1 }
 0x20f   :  { %v1686_v3 = vpack.c.bf16 %v1224_v61, %v1224_v61  ;;  %v1227_v12 = vadd.f32 %v2403_v34, %v1226_v2 }
 0x210   :  { %1456 = vst.msk [vmem:[%s2583_s10 + $0x28] sm:$0xf] %vm805_vm2, %v1688_v63  ;;  %v1689_v4 = vpack.c.bf16 %v1235_v1, %v1235_v1 }
 0x211   :  { %1454 = vst.msk [vmem:[%s2583_s10 + $0x20] sm:$0xf] %vm805_vm2, %v1686_v3  ;;  %v1687_v5 = vpack.c.bf16 %v1227_v12, %v1227_v12 }
 0x212   :  { %1457 = vst.msk [vmem:[%s2583_s10 + $0x2c] sm:$0xf] %vm805_vm2, %v1689_v4 }
 0x213   :  { %1455 = vst.msk [vmem:[%s2583_s10 + $0x24] sm:$0xf] %vm805_vm2, %v1687_v5  ;;  %v1920_v6 = vpop.f32.mrb[44].mxu1 }
 0x214   :  { %v1248_v7 = vadd.f32 %v1920_v6, %v2403_v34  ;;  %v1239_v8 = vpop.f32.mrb[45].mxu1 }
 0x215   :  { %v1240_v9 = vadd.f32 %v2403_v34, %v1239_v8  ;;  %v1921_v10 = vpop.f32.mrb[46].mxu1 }
 0x216   :  { %v1692_v11 = vpack.c.bf16 %v1248_v7, %v1248_v7  ;;  %v1251_v13 = vadd.f32 %v1921_v10, %v2403_v34  ;;  %v1242_v14 = vpop.f32.mrb[47].mxu1 }
 0x217   :  { %v1690_v15 = vpack.c.bf16 %v1240_v9, %v1240_v9  ;;  %v1243_v16 = vadd.f32 %v2403_v34, %v1242_v14 }
 0x218   :  { %1460 = vst.msk [vmem:[%s2583_s10 + $0x38] sm:$0xf] %vm805_vm2, %v1692_v11  ;;  %v1693_v17 = vpack.c.bf16 %v1251_v13, %v1251_v13 }
 0x219   :  { %1458 = vst.msk [vmem:[%s2583_s10 + $0x30] sm:$0xf] %vm805_vm2, %v1690_v15  ;;  %v1691_v18 = vpack.c.bf16 %v1243_v16, %v1243_v16 }
 0x21a   :  { %1461 = vst.msk [vmem:[%s2583_s10 + $0x3c] sm:$0xf] %vm805_vm2, %v1693_v17 }
 0x21b   :  { %1459 = vst.msk [vmem:[%s2583_s10 + $0x34] sm:$0xf] %vm805_vm2, %v1691_v18  ;;  %v1924_v25 = vpop.f32.mrb[48].mxu1 }
 0x21c   :  { %v1264_v19 = vadd.f32 %v1924_v25, %v2403_v34  ;;  %v1255_v20 = vpop.f32.mrb[49].mxu1 }
 0x21d   :  { %v1256_v21 = vadd.f32 %v2403_v34, %v1255_v20  ;;  %v1925_v22 = vpop.f32.mrb[50].mxu1 }
 0x21e   :  { %v1696_v23 = vpack.c.bf16 %v1264_v19, %v1264_v19  ;;  %v1267_v24 = vadd.f32 %v1925_v22, %v2403_v34  ;;  %v1258_v26 = vpop.f32.mrb[51].mxu1 }
 0x21f   :  { %v1694_v27 = vpack.c.bf16 %v1256_v21, %v1256_v21  ;;  %v1259_v28 = vadd.f32 %v2403_v34, %v1258_v26 }
 0x220   :  { %1464 = vst.msk [vmem:[%s2583_s10 + $0x48] sm:$0xf] %vm805_vm2, %v1696_v23  ;;  %v1697_v29 = vpack.c.bf16 %v1267_v24, %v1267_v24 }
 0x221   :  { %1462 = vst.msk [vmem:[%s2583_s10 + $0x40] sm:$0xf] %vm805_vm2, %v1694_v27  ;;  %v1695_v30 = vpack.c.bf16 %v1259_v28, %v1259_v28 }
 0x222   :  { %1465 = vst.msk [vmem:[%s2583_s10 + $0x4c] sm:$0xf] %vm805_vm2, %v1697_v29 }
 0x223   :  { %1463 = vst.msk [vmem:[%s2583_s10 + $0x44] sm:$0xf] %vm805_vm2, %v1695_v30  ;;  %v1928_v31 = vpop.f32.mrb[52].mxu1 }
 0x224   :  { %v1280_v32 = vadd.f32 %v1928_v31, %v2403_v34  ;;  %v1271_v33 = vpop.f32.mrb[53].mxu1 }
 0x225   :  { %v1272_v0 = vadd.f32 %v2403_v34, %v1271_v33  ;;  %v1929_v35 = vpop.f32.mrb[54].mxu1 }
 0x226   :  { %v1700_v36 = vpack.c.bf16 %v1280_v32, %v1280_v32  ;;  %v1283_v37 = vadd.f32 %v1929_v35, %v2403_v34  ;;  %v1274_v38 = vpop.f32.mrb[55].mxu1 }
 0x227   :  { %v1698_v39 = vpack.c.bf16 %v1272_v0, %v1272_v0  ;;  %v1275_v40 = vadd.f32 %v2403_v34, %v1274_v38 }
 0x228   :  { %1468 = vst.msk [vmem:[%s2583_s10 + $0x58] sm:$0xf] %vm805_vm2, %v1700_v36  ;;  %v1701_v41 = vpack.c.bf16 %v1283_v37, %v1283_v37 }
 0x229   :  { %1466 = vst.msk [vmem:[%s2583_s10 + $0x50] sm:$0xf] %vm805_vm2, %v1698_v39  ;;  %v1699_v42 = vpack.c.bf16 %v1275_v40, %v1275_v40 }
 0x22a   :  { %1469 = vst.msk [vmem:[%s2583_s10 + $0x5c] sm:$0xf] %vm805_vm2, %v1701_v41 }
 0x22b   :  { %1467 = vst.msk [vmem:[%s2583_s10 + $0x54] sm:$0xf] %vm805_vm2, %v1699_v42  ;;  %v1932_v43 = vpop.f32.mrb[56].mxu1 }
 0x22c   :  { %v1296_v44 = vadd.f32 %v1932_v43, %v2403_v34  ;;  %v1287_v45 = vpop.f32.mrb[57].mxu1 }
 0x22d   :  { %v1288_v46 = vadd.f32 %v2403_v34, %v1287_v45  ;;  %v1933_v47 = vpop.f32.mrb[58].mxu1 }
 0x22e   :  { %v1704_v48 = vpack.c.bf16 %v1296_v44, %v1296_v44  ;;  %v1299_v49 = vadd.f32 %v1933_v47, %v2403_v34  ;;  %v1290_v50 = vpop.f32.mrb[59].mxu1 }
 0x22f   :  { %v1702_v51 = vpack.c.bf16 %v1288_v46, %v1288_v46  ;;  %v1291_v52 = vadd.f32 %v2403_v34, %v1290_v50 }
 0x230   :  { %1472 = vst.msk [vmem:[%s2583_s10 + $0x68] sm:$0xf] %vm805_vm2, %v1704_v48  ;;  %v1705_v53 = vpack.c.bf16 %v1299_v49, %v1299_v49 }
 0x231   :  { %1470 = vst.msk [vmem:[%s2583_s10 + $0x60] sm:$0xf] %vm805_vm2, %v1702_v51  ;;  %v1703_v54 = vpack.c.bf16 %v1291_v52, %v1291_v52 }
 0x232   :  { %1473 = vst.msk [vmem:[%s2583_s10 + $0x6c] sm:$0xf] %vm805_vm2, %v1705_v53 }
 0x233   :  { %1471 = vst.msk [vmem:[%s2583_s10 + $0x64] sm:$0xf] %vm805_vm2, %v1703_v54  ;;  %v1936_v55 = vpop.f32.mrb[60].mxu1 }
 0x234   :  { %v1312_v56 = vadd.f32 %v1936_v55, %v2403_v34  ;;  %v1303_v57 = vpop.f32.mrb[61].mxu1 }
 0x235   :  { %v1304_v58 = vadd.f32 %v2403_v34, %v1303_v57  ;;  %v1937_v59 = vpop.f32.mrb[62].mxu1 }
 0x236   :  { %v1708_v60 = vpack.c.bf16 %v1312_v56, %v1312_v56  ;;  %v1315_v61 = vadd.f32 %v1937_v59, %v2403_v34  ;;  %v1306_v62 = vpop.f32.mrb[63].mxu1 }
 0x237   :  { %v1706_v63 = vpack.c.bf16 %v1304_v58, %v1304_v58  ;;  %v1307_v1 = vadd.f32 %v2403_v34, %v1306_v62 }
 0x238   :  { %1476 = vst.msk [vmem:[%s2583_s10 + $0x78] sm:$0xf] %vm805_vm2, %v1708_v60  ;;  %v1709_v2 = vpack.c.bf16 %v1315_v61, %v1315_v61 }
 0x239   :  { %1474 = vst.msk [vmem:[%s2583_s10 + $0x70] sm:$0xf] %vm805_vm2, %v1706_v63  ;;  %v1707_v3 = vpack.c.bf16 %v1307_v1, %v1307_v1 }
 0x23a   :  { %1477 = vst.msk [vmem:[%s2583_s10 + $0x7c] sm:$0xf] %vm805_vm2, %v1709_v2 }
 0x23b   :  { %1475 = vst.msk [vmem:[%s2583_s10 + $0x74] sm:$0xf] %vm805_vm2, %v1707_v3 }

</bundles_post_ra>
